<compile_context>
chip_gen: v5e
topology: v5e:2x2
jax: 0.10.0
libtpu: 0.0.40
codegen_flags: <defaults>
</compile_context>

<pallas_src>
import functools

import jax
import jax.numpy as jnp
from jax import lax
from jax.experimental import pallas as pl
from jax.experimental.pallas import tpu as pltpu

KSIZE = 5
STRIDE = 2
PAD = 2
BN_EPS = 1e-5
LANE = 128
SUBLANE = 8
TM_DEFAULT = 512  # M-tile size (rows); big enough to sit near the HBM roofline


def _round_up(x, m):
    return ((x + m - 1) // m) * m


def _vmem_budget(per_step_bytes):
    # per_step_bytes already includes double buffering; add headroom and clamp so the
    # request is safe on v5e/v6e (128 MiB) and v7x (64 MiB physical / 32 MiB scoped).
    return int(min(max(2 * per_step_bytes, 4 << 20), 48 << 20))


# --------------------- pass 1: conv tile + BN partial statistics ---------------------
def _conv_stats_kernel(patches_ref, w_ref, conv_ref, stats_ref):
    # patches_ref: [TM, K_pad] bf16   w_ref: [K_pad, C_pad] bf16
    # conv_ref:    [TM, C_pad] f32    stats_ref: [1, 2, C_pad] f32 (sum, sum of squares)
    conv = jnp.dot(patches_ref[...], w_ref[...], preferred_element_type=jnp.float32)
    conv_ref[...] = conv
    s = jnp.sum(conv, axis=0, keepdims=True)           # [1, C_pad]
    sq = jnp.sum(conv * conv, axis=0, keepdims=True)   # [1, C_pad]
    stats_ref[...] = jnp.concatenate([s, sq], axis=0).reshape(1, 2, -1)


# --------------------- pass 2: fused affine BN (folded gamma) + ReLU ---------------------
def _bn_relu_kernel(conv_ref, scale_ref, shift_ref, out_ref):
    # y = (conv - mean) * inv_std * gamma + beta  ==  conv * scale + shift
    y = conv_ref[...] * scale_ref[...] + shift_ref[...]
    out_ref[...] = jnp.maximum(y, 0.0).astype(out_ref.dtype)


def _im2col(x_pad_nhwc, ho, wo):
    # x_pad_nhwc: [N, H+2P, W+2P, Cin] (already spatially padded)
    # TODO(synk): build patch tiles in-kernel (manual DMA of padded NHWC row ranges per
    # M-tile) to avoid the ~6x HBM inflation of a materialized im2col matrix.
    slices = []
    for kh in range(KSIZE):
        for kw in range(KSIZE):
            sl = x_pad_nhwc[:, kh:kh + STRIDE * (ho - 1) + 1:STRIDE,
                               kw:kw + STRIDE * (wo - 1) + 1:STRIDE, :]  # [N,Ho,Wo,Cin]
            slices.append(sl)
    p = jnp.stack(slices, axis=0)                  # [25, N, Ho, Wo, Cin]
    p = jnp.transpose(p, (1, 2, 3, 4, 0))          # [N, Ho, Wo, Cin, 25] -> K order (cin, kh, kw)
    n, _, _, cin, _ = p.shape
    return p.reshape(n * ho * wo, cin * KSIZE * KSIZE)


@functools.partial(jax.jit, static_argnames=("out",))
def encoder_block_forward(x_nchw, weight, gamma, beta, out=False):
    """x_nchw: [N,Cin,H,W]; weight: [Cout,Cin,5,5] (PyTorch layout); gamma/beta: [Cout].
    Returns NCHW relu(bn(conv(x))); if out=True also the raw conv output (pre-BN)."""
    n, cin, h, w = x_nchw.shape
    cout = weight.shape[0]
    ho = (h + 2 * PAD - KSIZE) // STRIDE + 1
    wo = (w + 2 * PAD - KSIZE) // STRIDE + 1
    m = n * ho * wo
    k = cin * KSIZE * KSIZE

    # ---- im2col (wrapper-side), bf16 operands for the MXU ----
    x_nhwc = jnp.transpose(x_nchw, (0, 2, 3, 1)).astype(jnp.bfloat16)
    x_pad = jnp.pad(x_nhwc, ((0, 0), (PAD, PAD), (PAD, PAD), (0, 0)))
    patches = _im2col(x_pad, ho, wo)                                   # [M, K] bf16

    # ---- pad to lane/sublane friendly shapes ----
    k_pad = _round_up(k, LANE)
    c_pad = _round_up(cout, LANE)
    tm = TM_DEFAULT if m >= TM_DEFAULT else _round_up(m, SUBLANE)
    m_pad = _round_up(m, tm)
    num_tiles = m_pad // tm

    patches_p = jnp.pad(patches, ((0, m_pad - m), (0, k_pad - k)))     # zero rows/cols
    w_mat = jnp.transpose(weight.reshape(cout, k)).astype(jnp.bfloat16)  # [K, Cout]
    w_p = jnp.pad(w_mat, ((0, k_pad - k), (0, c_pad - cout)))

    # ---- pass 1: conv tiles + partial BN statistics ----
    vmem1 = 2 * (tm * k_pad * 2 + k_pad * c_pad * 2 + tm * c_pad * 4 + SUBLANE * c_pad * 4)
    conv_p, stats = pl.pallas_call(
        _conv_stats_kernel,
        out_shape=(
            jax.ShapeDtypeStruct((m_pad, c_pad), jnp.float32),
            jax.ShapeDtypeStruct((num_tiles, 2, c_pad), jnp.float32),
        ),
        grid=(num_tiles,),
        in_specs=[
            pl.BlockSpec((tm, k_pad), lambda i: (i, 0)),
            pl.BlockSpec((k_pad, c_pad), lambda i: (0, 0)),
        ],
        out_specs=(
            pl.BlockSpec((tm, c_pad), lambda i: (i, 0)),
            pl.BlockSpec((1, 2, c_pad), lambda i: (i, 0, 0)),
        ),
        compiler_params=pltpu.CompilerParams(
            dimension_semantics=("parallel",),
            vmem_limit_bytes=_vmem_budget(vmem1),
        ),
        cost_estimate=pl.CostEstimate(
            flops=2 * m_pad * k_pad * c_pad,
            transcendentals=0,
            bytes_accessed=(m_pad * k_pad * 2 + k_pad * c_pad * 2
                            + m_pad * c_pad * 4 + num_tiles * 2 * c_pad * 4),
        ),
    )(patches_p, w_p)

    # ---- reduce stats (tiny), fold gamma into scale; BN math in f32 ----
    # Padded rows/channels are exactly zero, so they contribute nothing to the sums;
    # divide by the true element count m.
    tot = jnp.sum(stats, axis=0)                                # [2, C_pad]
    mean = tot[0] / float(m)
    var = jnp.maximum(tot[1] / float(m) - mean * mean, 0.0)     # biased var (PyTorch train-mode)
    inv_std = lax.rsqrt(var + BN_EPS)
    gamma_p = jnp.pad(gamma.astype(jnp.float32), (0, c_pad - cout))
    beta_p = jnp.pad(beta.astype(jnp.float32), (0, c_pad - cout))
    g_inv = gamma_p * inv_std
    scale = g_inv.reshape(1, c_pad)
    shift = (beta_p - mean * g_inv).reshape(1, c_pad)
    # NOTE: PyTorch BatchNorm2d also updates running_mean/running_var (momentum=0.9,
    # unbiased var) as a training side effect; that state does not affect this forward
    # output and is not produced here.

    # ---- pass 2: normalize + ReLU ----
    vmem2 = 2 * (2 * tm * c_pad * 4 + 2 * SUBLANE * c_pad * 4)
    relu_p = pl.pallas_call(
        _bn_relu_kernel,
        out_shape=jax.ShapeDtypeStruct((m_pad, c_pad), jnp.float32),
        grid=(num_tiles,),
        in_specs=[
            pl.BlockSpec((tm, c_pad), lambda i: (i, 0)),
            pl.BlockSpec((1, c_pad), lambda i: (0, 0)),
            pl.BlockSpec((1, c_pad), lambda i: (0, 0)),
        ],
        out_specs=pl.BlockSpec((tm, c_pad), lambda i: (i, 0)),
        compiler_params=pltpu.CompilerParams(
            dimension_semantics=("parallel",),
            vmem_limit_bytes=_vmem_budget(vmem2),
        ),
        cost_estimate=pl.CostEstimate(
            flops=3 * m_pad * c_pad,
            transcendentals=0,
            bytes_accessed=2 * m_pad * c_pad * 4 + 2 * c_pad * 4,
        ),
    )(conv_p, scale, shift)

    def to_nchw(flat):
        return jnp.transpose(flat[:m, :cout].reshape(n, ho, wo, cout), (0, 3, 1, 2))

    if out:
        return to_nchw(relu_p), to_nchw(conv_p)
    return to_nchw(relu_p)


def _reference(x_nchw, weight, gamma, beta):
    # Pure-JAX reference. The kernel feeds the MXU bf16 operands (f32 accumulation), so
    # the reference rounds the conv operands to bf16 too — same contract, f32 math after.
    xb = x_nchw.astype(jnp.bfloat16).astype(jnp.float32)
    wb = weight.astype(jnp.bfloat16).astype(jnp.float32)
    conv = lax.conv_general_dilated(
        xb, wb, window_strides=(STRIDE, STRIDE), padding=((PAD, PAD), (PAD, PAD)),
        dimension_numbers=("NCHW", "OIHW", "NCHW"), precision=lax.Precision.HIGHEST)
    mean = jnp.mean(conv, axis=(0, 2, 3), keepdims=True)
    var = jnp.mean((conv - mean) ** 2, axis=(0, 2, 3), keepdims=True)
    y = (conv - mean) * lax.rsqrt(var + BN_EPS)
    y = y * gamma.reshape(1, -1, 1, 1) + beta.reshape(1, -1, 1, 1)
    return jnp.maximum(y, 0.0)


if __name__ == "__main__":
    key = jax.random.PRNGKey(0)
    k_x, k_w = jax.random.split(key)

    N, C_IN, C_OUT, H, W = 2, 4, 8, 16, 16
    x = jax.random.normal(k_x, (N, C_IN, H, W), dtype=jnp.float32)

    # Deterministic parameter init (shapes match nn.Conv2d / nn.BatchNorm2d __init__)
    fan_in = C_IN * KSIZE * KSIZE
    bound = 1.0 / (fan_in ** 0.5)
    weight = jax.random.uniform(k_w, (C_OUT, C_IN, KSIZE, KSIZE),
                                minval=-bound, maxval=bound, dtype=jnp.float32)
    gamma = jnp.ones((C_OUT,), dtype=jnp.float32)   # BN weight
    beta = jnp.zeros((C_OUT,), dtype=jnp.float32)   # BN bias

    out = encoder_block_forward(x, weight, gamma, beta, out=False)
    out = jax.block_until_ready(out)

    ref = _reference(x, weight, gamma, beta)
    assert out.shape == (N, C_OUT, H // 2, W // 2), out.shape
    assert jnp.allclose(out, ref, atol=1e-3, rtol=1e-3), "mismatch vs reference"

    # also exercise the out=True branch (returns (relu(bn(conv)), raw conv))
    ten, ten_out = encoder_block_forward(x, weight, gamma, beta, out=True)
    jax.block_until_ready((ten, ten_out))
    assert ten.shape == (N, C_OUT, H // 2, W // 2)
    assert ten_out.shape == (N, C_OUT, H // 2, W // 2)

    print("KERNEL_OK")
</pallas_src>

<mosaic_0001>
module attributes {stable_mosaic.version = 11 : i64} {
  func.func @_conv_stats_kernel(%arg0: i32, %arg1: memref<128x128xbf16, #tpu.memory_space<vmem>>, %arg2: memref<128x128xbf16, #tpu.memory_space<vmem>>, %arg3: memref<128x128xf32, #tpu.memory_space<vmem>>, %arg4: memref<1x2x128xf32, #tpu.memory_space<vmem>>) attributes {dimension_semantics = [#tpu.dimension_semantics<parallel>], iteration_bounds = array<i64: 1>, scalar_prefetch = 0 : i64, scratch_operands = 0 : i64, tpu.core_type = #tpu.core_type<tc>, window_params = [{transform_indices = @transform_0, window_bounds = array<i64: 128, 128>}, {pipeline_mode = #tpu.pipeline_mode<synchronous>, transform_indices = @transform_1, window_bounds = array<i64: 128, 128>}, {transform_indices = @transform_2, window_bounds = array<i64: 128, 128>}, {transform_indices = @transform_3, window_bounds = array<i64: 1, 2, 128>}]} {
    %c0 = arith.constant 0 : index
    %c0_0 = arith.constant 0 : index
    %0 = vector.load %arg1[%c0, %c0_0] : memref<128x128xbf16, #tpu.memory_space<vmem>>, vector<128x128xbf16>
    %c0_1 = arith.constant 0 : index
    %c0_2 = arith.constant 0 : index
    %1 = vector.load %arg2[%c0_1, %c0_2] : memref<128x128xbf16, #tpu.memory_space<vmem>>, vector<128x128xbf16>
    %cst = arith.constant dense<0.000000e+00> : vector<128x128xf32>
    %2 = tpu.matmul %0, %1, %cst {dimension_numbers = #tpu.dot_dimension_numbers<[1], [0], [0], [1], [0, 0, 1, 1], [], []>} : vector<128x128xbf16>, vector<128x128xbf16>, vector<128x128xf32> -> vector<128x128xf32>
    %c0_3 = arith.constant 0 : index
    %c0_4 = arith.constant 0 : index
    %3 = vector.load %arg3[%c0_3, %c0_4] : memref<128x128xf32, #tpu.memory_space<vmem>>, vector<128x128xf32>
    tpu.vector_store %arg3[%c0_3, %c0_4], %2 {strides = array<i32>} : memref<128x128xf32, #tpu.memory_space<vmem>>, vector<128x128xf32>,
    %cst_5 = arith.constant dense<0.000000e+00> : vector<128xf32>
    %4 = vector.multi_reduction <add>, %2, %cst_5 [0] : vector<128x128xf32> to vector<128xf32>
    %5 = vector.shape_cast %4 : vector<128xf32> to vector<1x128xf32>
    %6 = arith.mulf %2, %2 : vector<128x128xf32>
    %cst_6 = arith.constant dense<0.000000e+00> : vector<128xf32>
    %7 = vector.multi_reduction <add>, %6, %cst_6 [0] : vector<128x128xf32> to vector<128xf32>
    %8 = vector.shape_cast %7 : vector<128xf32> to vector<1x128xf32>
    %9 = tpu.concatenate %5, %8 in 0 : vector<1x128xf32>, vector<1x128xf32> -> vector<2x128xf32>
    %10 = vector.shape_cast %9 : vector<2x128xf32> to vector<1x2x128xf32>
    %c0_7 = arith.constant 0 : index
    %c0_8 = arith.constant 0 : index
    %c0_9 = arith.constant 0 : index
    %11 = vector.load %arg4[%c0_7, %c0_8, %c0_9] : memref<1x2x128xf32, #tpu.memory_space<vmem>>, vector<1x2x128xf32>
    tpu.vector_store %arg4[%c0_7, %c0_8, %c0_9], %10 {strides = array<i32>} : memref<1x2x128xf32, #tpu.memory_space<vmem>>, vector<1x2x128xf32>,
    return
  }
  func.func @transform_0(%arg0: i32) -> (i32, i32) {
    %c0_i32 = arith.constant 0 : i32
    %c0_i32_0 = arith.constant 0 : i32
    return %arg0, %c0_i32 : i32, i32
  }
  func.func @transform_1(%arg0: i32) -> (i32, i32) {
    %c0_i32 = arith.constant 0 : i32
    %c0_i32_0 = arith.constant 0 : i32
    %c0_i32_1 = arith.constant 0 : i32
    return %c0_i32, %c0_i32_0 : i32, i32
  }
  func.func @transform_2(%arg0: i32) -> (i32, i32) {
    %c0_i32 = arith.constant 0 : i32
    %c0_i32_0 = arith.constant 0 : i32
    return %arg0, %c0_i32 : i32, i32
  }
  func.func @transform_3(%arg0: i32) -> (i32, i32, i32) {
    %c0_i32 = arith.constant 0 : i32
    %c0_i32_0 = arith.constant 0 : i32
    %c0_i32_1 = arith.constant 0 : i32
    return %arg0, %c0_i32, %c0_i32_0 : i32, i32, i32
  }
}

module attributes {stable_mosaic.version = 11 : i64} {
  func.func @_bn_relu_kernel(%arg0: i32, %arg1: memref<128x128xf32, #tpu.memory_space<vmem>>, %arg2: memref<1x128xf32, #tpu.memory_space<vmem>>, %arg3: memref<1x128xf32, #tpu.memory_space<vmem>>, %arg4: memref<128x128xf32, #tpu.memory_space<vmem>>) attributes {dimension_semantics = [#tpu.dimension_semantics<parallel>], iteration_bounds = array<i64: 1>, scalar_prefetch = 0 : i64, scratch_operands = 0 : i64, tpu.core_type = #tpu.core_type<tc>, window_params = [{transform_indices = @transform_0, window_bounds = array<i64: 128, 128>}, {pipeline_mode = #tpu.pipeline_mode<synchronous>, transform_indices = @transform_1, window_bounds = array<i64: 1, 128>}, {pipeline_mode = #tpu.pipeline_mode<synchronous>, transform_indices = @transform_2, window_bounds = array<i64: 1, 128>}, {transform_indices = @transform_3, window_bounds = array<i64: 128, 128>}]} {
    %c0 = arith.constant 0 : index
    %c0_0 = arith.constant 0 : index
    %0 = vector.load %arg1[%c0, %c0_0] : memref<128x128xf32, #tpu.memory_space<vmem>>, vector<128x128xf32>
    %c0_1 = arith.constant 0 : index
    %c0_2 = arith.constant 0 : index
    %1 = vector.load %arg2[%c0_1, %c0_2] : memref<1x128xf32, #tpu.memory_space<vmem>>, vector<1x128xf32>
    %2 = vector.broadcast %1 : vector<1x128xf32> to vector<128x128xf32>
    %3 = arith.mulf %0, %2 : vector<128x128xf32>
    %c0_3 = arith.constant 0 : index
    %c0_4 = arith.constant 0 : index
    %4 = vector.load %arg3[%c0_3, %c0_4] : memref<1x128xf32, #tpu.memory_space<vmem>>, vector<1x128xf32>
    %5 = vector.broadcast %4 : vector<1x128xf32> to vector<128x128xf32>
    %6 = arith.addf %3, %5 : vector<128x128xf32>
    %cst = arith.constant 0.000000e+00 : f32
    %7 = vector.broadcast %cst : f32 to vector<128x128xf32>
    %8 = arith.maximumf %6, %7 : vector<128x128xf32>
    %c0_5 = arith.constant 0 : index
    %c0_6 = arith.constant 0 : index
    %9 = vector.load %arg4[%c0_5, %c0_6] : memref<128x128xf32, #tpu.memory_space<vmem>>, vector<128x128xf32>
    tpu.vector_store %arg4[%c0_5, %c0_6], %8 {strides = array<i32>} : memref<128x128xf32, #tpu.memory_space<vmem>>, vector<128x128xf32>,
    return
  }
  func.func @transform_0(%arg0: i32) -> (i32, i32) {
    %c0_i32 = arith.constant 0 : i32
    %c0_i32_0 = arith.constant 0 : i32
    return %arg0, %c0_i32 : i32, i32
  }
  func.func @transform_1(%arg0: i32) -> (i32, i32) {
    %c0_i32 = arith.constant 0 : i32
    %c0_i32_0 = arith.constant 0 : i32
    %c0_i32_1 = arith.constant 0 : i32
    return %c0_i32, %c0_i32_0 : i32, i32
  }
  func.func @transform_2(%arg0: i32) -> (i32, i32) {
    %c0_i32 = arith.constant 0 : i32
    %c0_i32_0 = arith.constant 0 : i32
    %c0_i32_1 = arith.constant 0 : i32
    return %c0_i32, %c0_i32_0 : i32, i32
  }
  func.func @transform_3(%arg0: i32) -> (i32, i32) {
    %c0_i32 = arith.constant 0 : i32
    %c0_i32_0 = arith.constant 0 : i32
    return %arg0, %c0_i32 : i32, i32
  }
}

</mosaic_0001>

<bundles_post_ra>
// kernel: encoder_block_forward.3
= control target key start
LH: loop header
LB: loop body
LE: loop exit
PB: predicated region body
PF: predicated region fallthrough
CT: control target
= control target key end

     0   :  { %s248_s0 = inlined_call_operand.vmem [shape: f32[128,128], index: 0, kind: input, shape index: {}]   ;;  %s249_s1 = inlined_call_operand.vmem [shape: f32[1,128], index: 1, kind: input, shape index: {}]   ;;  %s250_s2 = inlined_call_operand.vmem [shape: f32[1,128], index: 2, kind: input, shape index: {}]   ;;  %s251_s3 = inlined_call_operand.vmem [shape: f32[128,128], index: 3, kind: output, shape index: {}]  }
   0x1   :  { %v14_v0 = vld [vmem:[%s248_s0] sm:$0xff]  ;;  %v15_v3 = vld [vmem:[%s248_s0 + $0x8] sm:$0xff]  ;;  %v16_v6 = vld [vmem:[%s248_s0 + $0x10] sm:$0xff] }
   0x2   :  { %v106_v1 = vld [vmem:[%s249_s1] ss:$0 sm:$0xff]  ;;  %v17_v7 = vld [vmem:[%s248_s0 + $0x18] sm:$0xff]  ;;  %v19_v12 = vld [vmem:[%s248_s0 + $0x28] sm:$0xff] }
   0x3   :  { %v137_v2 = vld [vmem:[%s250_s2] ss:$0 sm:$0xff]  ;;  %v34_v4 = vmul.f32 %v106_v1, %v14_v0  ;;  %v35_v5 = vmul.f32 %v106_v1, %v15_v3  ;;  %v36_v9 = vmul.f32 %v106_v1, %v16_v6  ;;  %v37_v10 = vmul.f32 %v106_v1, %v17_v7  ;;  %v20_v13 = vld [vmem:[%s248_s0 + $0x30] sm:$0xff]  ;;  %v21_v14 = vld [vmem:[%s248_s0 + $0x38] sm:$0xff] }
   0x4   :  { %v18_v8 = vld [vmem:[%s248_s0 + $0x20] sm:$0xff]  ;;  %v39_v17 = vmul.f32 %v106_v1, %v19_v12  ;;  %v40_v18 = vmul.f32 %v106_v1, %v20_v13  ;;  %v41_v22 = vmul.f32 %v106_v1, %v21_v14  ;;  %v23_v24 = vld [vmem:[%s248_s0 + $0x48] sm:$0xff]  ;;  %v24_v29 = vld [vmem:[%s248_s0 + $0x50] sm:$0xff] }
   0x5   :  { %v38_v11 = vmul.f32 %v106_v1, %v18_v8  ;;  %v54_v15 = vadd.f32 %v137_v2, %v34_v4  ;;  %v55_v16 = vadd.f32 %v137_v2, %v35_v5  ;;  %v56_v19 = vadd.f32 %v137_v2, %v36_v9  ;;  %v22_v23 = vld [vmem:[%s248_s0 + $0x40] sm:$0xff]  ;;  %v25_v30 = vld [vmem:[%s248_s0 + $0x58] sm:$0xff]  ;;  %v27_v35 = vld [vmem:[%s248_s0 + $0x68] sm:$0xff] }
   0x6   :  { %v57_v20 = vadd.f32 %v137_v2, %v37_v10  ;;  %v59_v27 = vadd.f32 %v137_v2, %v39_v17  ;;  %v60_v28 = vadd.f32 %v137_v2, %v40_v18  ;;  %v26_v31 = vld [vmem:[%s248_s0 + $0x60] sm:$0xff]  ;;  %v61_v34 = vadd.f32 %v137_v2, %v41_v22  ;;  %v28_v36 = vld [vmem:[%s248_s0 + $0x70] sm:$0xff]  ;;  %v29_v41 = vld [vmem:[%s248_s0 + $0x78] sm:$0xff] }
   0x7   :  { %v58_v21 = vadd.f32 %v137_v2, %v38_v11  ;;  %v70_v25 = vmax.f32 %v54_v15, 0.0  ;;  %v71_v26 = vmax.f32 %v55_v16, 0.0  ;;  %v72_v32 = vmax.f32 %v56_v19, 0.0 }
   0x8   :  { %v73_v33 = vmax.f32 %v57_v20, 0.0  ;;  %v75_v38 = vmax.f32 %v59_v27, 0.0  ;;  %v42_v39 = vmul.f32 %v106_v1, %v22_v23  ;;  %v43_v40 = vmul.f32 %v106_v1, %v23_v24 }
   0x9   :  { %86 = vst [vmem:[%s251_s3] sm:$0xff] %v70_v25  ;;  %v74_v37 = vmax.f32 %v58_v21, 0.0  ;;  %v76_v42 = vmax.f32 %v60_v28, 0.0  ;;  %v44_v43 = vmul.f32 %v106_v1, %v24_v29  ;;  %v45_v44 = vmul.f32 %v106_v1, %v25_v30 }
   0xa   :  { %87 = vst [vmem:[%s251_s3 + $0x8] sm:$0xff] %v71_v26  ;;  %v46_v45 = vmul.f32 %v106_v1, %v26_v31  ;;  %v62_v46 = vadd.f32 %v137_v2, %v42_v39  ;;  %v63_v47 = vadd.f32 %v137_v2, %v43_v40  ;;  %v47_v48 = vmul.f32 %v106_v1, %v27_v35 }
   0xb   :  { %88 = vst [vmem:[%s251_s3 + $0x10] sm:$0xff] %v72_v32  ;;  %v48_v49 = vmul.f32 %v106_v1, %v28_v36  ;;  %v77_v50 = vmax.f32 %v61_v34, 0.0  ;;  %v64_v51 = vadd.f32 %v137_v2, %v44_v43  ;;  %v65_v52 = vadd.f32 %v137_v2, %v45_v44 }
   0xc   :  { %89 = vst [vmem:[%s251_s3 + $0x18] sm:$0xff] %v73_v33  ;;  %v49_v53 = vmul.f32 %v106_v1, %v29_v41  ;;  %v78_v54 = vmax.f32 %v62_v46, 0.0  ;;  %v66_v55 = vadd.f32 %v137_v2, %v46_v45  ;;  %v79_v56 = vmax.f32 %v63_v47, 0.0 }
   0xd   :  { %90 = vst [vmem:[%s251_s3 + $0x20] sm:$0xff] %v74_v37  ;;  %v67_v57 = vadd.f32 %v137_v2, %v47_v48  ;;  %v80_v58 = vmax.f32 %v64_v51, 0.0  ;;  %v68_v59 = vadd.f32 %v137_v2, %v48_v49  ;;  %v81_v60 = vmax.f32 %v65_v52, 0.0 }
   0xe   :  { %91 = vst [vmem:[%s251_s3 + $0x28] sm:$0xff] %v75_v38  ;;  %v69_v61 = vadd.f32 %v137_v2, %v49_v53  ;;  %v82_v62 = vmax.f32 %v66_v55, 0.0 }
   0xf   :  { %92 = vst [vmem:[%s251_s3 + $0x30] sm:$0xff] %v76_v42  ;;  %v83_v63 = vmax.f32 %v67_v57, 0.0  ;;  %v84_v0 = vmax.f32 %v68_v59, 0.0 }
  0x10   :  { %93 = vst [vmem:[%s251_s3 + $0x38] sm:$0xff] %v77_v50  ;;  %v85_v1 = vmax.f32 %v69_v61, 0.0 }
  0x11   :  { %94 = vst [vmem:[%s251_s3 + $0x40] sm:$0xff] %v78_v54 }
  0x12   :  { %95 = vst [vmem:[%s251_s3 + $0x48] sm:$0xff] %v79_v56 }
  0x13   :  { %96 = vst [vmem:[%s251_s3 + $0x50] sm:$0xff] %v80_v58 }
  0x14   :  { %97 = vst [vmem:[%s251_s3 + $0x58] sm:$0xff] %v81_v60 }
  0x15   :  { %98 = vst [vmem:[%s251_s3 + $0x60] sm:$0xff] %v82_v62 }
  0x16   :  { %99 = vst [vmem:[%s251_s3 + $0x68] sm:$0xff] %v83_v63 }
  0x17   :  { %100 = vst [vmem:[%s251_s3 + $0x70] sm:$0xff] %v84_v0 }
  0x18   :  { %101 = vst [vmem:[%s251_s3 + $0x78] sm:$0xff] %v85_v1 }

// kernel: encoder_block_forward.2
= control target key start
LH: loop header
LB: loop body
LE: loop exit
PB: predicated region body
PF: predicated region fallthrough
CT: control target
= control target key end

     0   :  { %vm264_vm0 = vcmask 1040384   ;;  %s498_s1 = inlined_call_operand.vmem [shape: bf16[128,128], index: 1, kind: input, shape index: {}]   ;;  %s499_s0 = inlined_call_operand.vmem [shape: bf16[128,128], index: 0, kind: input, shape index: {}]   ;;  %s500_s2 = inlined_call_operand.vmem [shape: f32[128,128], index: 2, kind: output, shape index: {0}]   ;;  %s501_s3 = inlined_call_operand.vmem [shape: f32[1,2,128], index: 3, kind: output, shape index: {1}]  }
   0x1   :  { %v354_v0 = vld [vmem:[%s498_s1 + $0x38] sm:$0xff]  ;;  %v353_v1 = vld [vmem:[%s498_s1 + $0x30] sm:$0xff]  ;;  %v352_v2 = vld [vmem:[%s498_s1 + $0x28] sm:$0xff] }
   0x2   :  { %141 = vmatpush.bf16.msra.mxu0 %v354_v0  ;;  %355 = vmatpush.bf16.msra.mxu1 %v354_v0  ;;  %v351_v3 = vld [vmem:[%s498_s1 + $0x20] sm:$0xff]  ;;  %v350_v4 = vld [vmem:[%s498_s1 + $0x18] sm:$0xff]  ;;  %v349_v5 = vld [vmem:[%s498_s1 + $0x10] sm:$0xff] }
   0x3   :  { %356 = vmatpush.bf16.msra.mxu2 %v354_v0  ;;  %357 = vmatpush.bf16.msra.mxu3 %v354_v0  ;;  %v348_v6 = vld [vmem:[%s498_s1 + $0x8] sm:$0xff]  ;;  %v347_v7 = vld [vmem:[%s498_s1] sm:$0xff]  ;;  %v341_v9 = vld [vmem:[%s499_s0 + $0x10] sm:$0xff] }
   0x4   :  { %v339_v8 = vld [vmem:[%s499_s0] sm:$0xff]  ;;  %v345_v11 = vld [vmem:[%s499_s0 + $0x30] sm:$0xff]  ;;  %v340_v12 = vld [vmem:[%s499_s0 + $0x8] sm:$0xff] }
   0x5   :  { %v343_v10 = vld [vmem:[%s499_s0 + $0x20] sm:$0xff]  ;;  %v342_v13 = vld [vmem:[%s499_s0 + $0x18] sm:$0xff]  ;;  %v344_v14 = vld [vmem:[%s499_s0 + $0x28] sm:$0xff] }
   0x6   :  { %142 = vmatpush.bf16.msra.mxu0 %v353_v1  ;;  %358 = vmatpush.bf16.msra.mxu1 %v353_v1  ;;  %v346_v15 = vld [vmem:[%s499_s0 + $0x38] sm:$0xff] }
   0x7   :  { %359 = vmatpush.bf16.msra.mxu2 %v353_v1  ;;  %360 = vmatpush.bf16.msra.mxu3 %v353_v1 }
   0xa   :  { %143 = vmatpush.bf16.msra.mxu0 %v352_v2  ;;  %361 = vmatpush.bf16.msra.mxu1 %v352_v2 }
   0xb   :  { %362 = vmatpush.bf16.msra.mxu2 %v352_v2  ;;  %363 = vmatpush.bf16.msra.mxu3 %v352_v2 }
   0xe   :  { %144 = vmatpush.bf16.msra.mxu0 %v351_v3  ;;  %364 = vmatpush.bf16.msra.mxu1 %v351_v3 }
   0xf   :  { %365 = vmatpush.bf16.msra.mxu2 %v351_v3  ;;  %366 = vmatpush.bf16.msra.mxu3 %v351_v3 }
  0x12   :  { %145 = vmatpush.bf16.msra.mxu0 %v350_v4  ;;  %367 = vmatpush.bf16.msra.mxu1 %v350_v4 }
  0x13   :  { %368 = vmatpush.bf16.msra.mxu2 %v350_v4  ;;  %369 = vmatpush.bf16.msra.mxu3 %v350_v4 }
  0x16   :  { %146 = vmatpush.bf16.msra.mxu0 %v349_v5  ;;  %370 = vmatpush.bf16.msra.mxu1 %v349_v5 }
  0x17   :  { %371 = vmatpush.bf16.msra.mxu2 %v349_v5  ;;  %372 = vmatpush.bf16.msra.mxu3 %v349_v5 }
  0x1a   :  { %147 = vmatpush.bf16.msra.mxu0 %v348_v6  ;;  %373 = vmatpush.bf16.msra.mxu1 %v348_v6 }
  0x1b   :  { %374 = vmatpush.bf16.msra.mxu2 %v348_v6  ;;  %375 = vmatpush.bf16.msra.mxu3 %v348_v6 }
  0x1e   :  { %148 = vmatpush.bf16.msra.mxu0 %v347_v7  ;;  %376 = vmatpush.bf16.msra.mxu1 %v347_v7 }
  0x1f   :  { %377 = vmatpush.bf16.msra.mxu2 %v347_v7  ;;  %378 = vmatpush.bf16.msra.mxu3 %v347_v7 }
  0x21   :  { %149 = vmatmul.bf16.vlgmr.msra.gmra.mxu0 %v339_v8  ;;  %159 = vmatmul.bf16.vlgmr.msra.gmra.mxu1 %v341_v9 }
  0x22   :  { %169 = vmatmul.bf16.vlgmr.msra.gmra.mxu2 %v343_v10  ;;  %179 = vmatmul.bf16.vlgmr.msra.gmra.mxu3 %v345_v11 }
  0x31   :  { %154 = vmatmul.bf16.gmra.mxu0 %v340_v12  ;;  %164 = vmatmul.bf16.gmra.mxu1 %v342_v13 }
  0x32   :  { %174 = vmatmul.bf16.gmra.mxu2 %v344_v14  ;;  %184 = vmatmul.bf16.gmra.mxu3 %v346_v15 }
  0x9e   :  { %v150_v16 = vpop.f32.mrf.mxu0  ;;  %v160_v17 = vpop.f32.mrf.mxu1 }
  0x9f   :  { %190 = vst [vmem:[%s500_s2] sm:$0xff] %v150_v16  ;;  %v227_v27 = vmul.f32 %v150_v16, %v150_v16  ;;  %v231_v39 = vmul.f32 %v160_v17, %v160_v17 }
  0xa0   :  { %194 = vst [vmem:[%s500_s2 + $0x20] sm:$0xff] %v160_v17 }
  0xa5   :  { %v170_v18 = vpop.f32.mrf.mxu2  ;;  %v180_v19 = vpop.f32.mrf.mxu3 }
  0xa6   :  { %v152_v20 = vpop.f32.mrf.mxu0  ;;  %v162_v21 = vpop.f32.mrf.mxu1  ;;  %198 = vst [vmem:[%s500_s2 + $0x40] sm:$0xff] %v170_v18  ;;  %v235_v53 = vmul.f32 %v170_v18, %v170_v18  ;;  %v239_v1 = vmul.f32 %v180_v19, %v180_v19 }
  0xa7   :  { %191 = vst [vmem:[%s500_s2 + $0x8] sm:$0xff] %v152_v20  ;;  %v228_v26 = vmul.f32 %v152_v20, %v152_v20  ;;  %v206_v28 = vadd.f32 %v152_v20, %v150_v16  ;;  %v232_v42 = vmul.f32 %v162_v21, %v162_v21 }
  0xa8   :  { %195 = vst [vmem:[%s500_s2 + $0x28] sm:$0xff] %v162_v21 }
  0xa9   :  { %202 = vst [vmem:[%s500_s2 + $0x60] sm:$0xff] %v180_v19  ;;  %v243_v30 = vadd.f32 %v228_v26, %v227_v27 }
  0xad   :  { %v172_v22 = vpop.f32.mrf.mxu2  ;;  %v182_v23 = vpop.f32.mrf.mxu3 }
  0xae   :  { %v155_v24 = vpop.f32.mrf.mxu0  ;;  %v165_v25 = vpop.f32.mrf.mxu1  ;;  %199 = vst [vmem:[%s500_s2 + $0x48] sm:$0xff] %v172_v22  ;;  %v236_v56 = vmul.f32 %v172_v22, %v172_v22  ;;  %v240_v4 = vmul.f32 %v182_v23, %v182_v23 }
  0xaf   :  { %192 = vst [vmem:[%s500_s2 + $0x10] sm:$0xff] %v155_v24  ;;  %v229_v29 = vmul.f32 %v155_v24, %v155_v24  ;;  %v207_v31 = vadd.f32 %v206_v28, %v155_v24  ;;  %v233_v45 = vmul.f32 %v165_v25, %v165_v25 }
  0xb0   :  { %196 = vst [vmem:[%s500_s2 + $0x30] sm:$0xff] %v165_v25 }
  0xb1   :  { %203 = vst [vmem:[%s500_s2 + $0x68] sm:$0xff] %v182_v23  ;;  %v244_v36 = vadd.f32 %v243_v30, %v229_v29 }
  0xb5   :  { %v175_v32 = vpop.f32.mrf.mxu2  ;;  %v185_v33 = vpop.f32.mrf.mxu3 }
  0xb6   :  { %v157_v34 = vpop.f32.mrf.mxu0  ;;  %v167_v35 = vpop.f32.mrf.mxu1  ;;  %200 = vst [vmem:[%s500_s2 + $0x50] sm:$0xff] %v175_v32  ;;  %v237_v60 = vmul.f32 %v175_v32, %v175_v32  ;;  %v241_v8 = vmul.f32 %v185_v33, %v185_v33 }
  0xb7   :  { %193 = vst [vmem:[%s500_s2 + $0x18] sm:$0xff] %v157_v34  ;;  %v208_v37 = vadd.f32 %v207_v31, %v157_v34  ;;  %v230_v38 = vmul.f32 %v157_v34, %v157_v34  ;;  %v234_v51 = vmul.f32 %v167_v35, %v167_v35 }
  0xb8   :  { %197 = vst [vmem:[%s500_s2 + $0x38] sm:$0xff] %v167_v35 }
  0xb9   :  { %v209_v40 = vadd.f32 %v208_v37, %v160_v17  ;;  %v245_v41 = vadd.f32 %v244_v36, %v230_v38  ;;  %204 = vst [vmem:[%s500_s2 + $0x70] sm:$0xff] %v185_v33 }
  0xbb   :  { %v246_v43 = vadd.f32 %v245_v41, %v231_v39  ;;  %v210_v44 = vadd.f32 %v209_v40, %v162_v21 }
  0xbd   :  { %v211_v46 = vadd.f32 %v210_v44, %v165_v25  ;;  %v247_v47 = vadd.f32 %v246_v43, %v232_v42  ;;  %v177_v48 = vpop.f32.mrf.mxu2  ;;  %v187_v49 = vpop.f32.mrf.mxu3 }
  0xbe   :  { %201 = vst [vmem:[%s500_s2 + $0x58] sm:$0xff] %v177_v48  ;;  %v238_v0 = vmul.f32 %v177_v48, %v177_v48  ;;  %v242_v12 = vmul.f32 %v187_v49, %v187_v49 }
  0xbf   :  { %v212_v50 = vadd.f32 %v211_v46, %v167_v35  ;;  %v248_v52 = vadd.f32 %v247_v47, %v233_v45  ;;  %205 = vst [vmem:[%s500_s2 + $0x78] sm:$0xff] %v187_v49 }
  0xc1   :  { %v213_v54 = vadd.f32 %v212_v50, %v170_v18  ;;  %v249_v55 = vadd.f32 %v248_v52, %v234_v51 }
  0xc3   :  { %v250_v57 = vadd.f32 %v249_v55, %v235_v53  ;;  %v214_v58 = vadd.f32 %v213_v54, %v172_v22 }
  0xc5   :  { %v215_v59 = vadd.f32 %v214_v58, %v175_v32  ;;  %v251_v61 = vadd.f32 %v250_v57, %v236_v56 }
  0xc7   :  { %v252_v62 = vadd.f32 %v251_v61, %v237_v60  ;;  %v216_v63 = vadd.f32 %v215_v59, %v177_v48 }
  0xc9   :  { %v217_v2 = vadd.f32 %v216_v63, %v180_v19  ;;  %v253_v3 = vadd.f32 %v252_v62, %v238_v0 }
  0xcb   :  { %v254_v5 = vadd.f32 %v253_v3, %v239_v1  ;;  %v218_v6 = vadd.f32 %v217_v2, %v182_v23 }
  0xcd   :  { %v219_v7 = vadd.f32 %v218_v6, %v185_v33  ;;  %v255_v9 = vadd.f32 %v254_v5, %v240_v4 }
  0xcf   :  { %v256_v10 = vadd.f32 %v255_v9, %v241_v8  ;;  %v220_v11 = vadd.f32 %v219_v7, %v187_v49 }
  0xd1   :  { %v221_v13 = vrot.slane %v220_v11, 4  ;;  %v257_v14 = vadd.f32 %v256_v10, %v242_v12 }
  0xd3   :  { %v222_v15 = vadd.f32 %v221_v13, %v220_v11  ;;  %v258_v16 = vrot.slane %v257_v14, 4 }
  0xd5   :  { %v223_v17 = vrot.slane %v222_v15, 2  ;;  %v259_v18 = vadd.f32 %v258_v16, %v257_v14 }
  0xd7   :  { %v224_v20 = vadd.f32 %v223_v17, %v222_v15  ;;  %v260_v21 = vrot.slane %v259_v18, 2 }
  0xd9   :  { %v225_v22 = vrot.slane %v224_v20, 1  ;;  %v261_v19 = vadd.f32 %v260_v21, %v259_v18 }
  0xdb   :  { %v262_v24 = vrot.slane %v261_v19, 1  ;;  %v226_v25 = vadd.f32 %v225_v22, %v224_v20 }
  0xdd   :  { %v263_v23 = vadd.f32 %v262_v24, %v261_v19 }
  0xdf   :  { %v265_v26 = vsel %vm264_vm0, %v226_v25, %v263_v23 }
  0xe0   :  { %266 = vst [vmem:[%s501_s3] sm:$0x3] %v265_v26 }

</bundles_post_ra>
